<compile_context>
chip_gen: v7x
topology: tpu7x:2x2x1
jax: 0.10.0
libtpu: 0.0.40
codegen_flags: <defaults>
</compile_context>

<pallas_src>
from functools import partial

import jax
import jax.numpy as jnp
from jax.experimental import pallas as pl
from jax.experimental.pallas import tpu as pltpu


def _round_up(n, m):
    return ((n + m - 1) // m) * m


def _seq2seq_kernel(x_ref,        # (2F, Bm)  rows [x0^T ; x1^T], batch in lanes
                    w_in_ref,     # (3H, 2F)  [wih_e^T 0 ; 0 wih_e^T ; 0 wih_d^T]
                    whh_eT_ref,   # (H, H)
                    beT_ref,      # (H, 1)
                    whh_dT_ref,   # (H, H)
                    bdT_ref,      # (H, 1)
                    wfT_ref,      # (H, H)   (wout @ wih_d + whh_d)^T
                    bfT_ref,      # (H, 1)   (bd + bout @ wih_d)^T
                    woutT_ref,    # (F, H)
                    boutT_ref,    # (F, 1)
                    y_ref,        # (2F, Bm)  rows [o0^T ; o1^T]
                    *, n_features, hidden):
    F = n_features
    H = hidden

    x_t = x_ref[...]                                  # (2F, Bm)

    # One fused input-projection matmul (single stationary-weight load):
    #   rows [0:H)   = wih_e^T @ x0^T
    #   rows [H:2H)  = wih_e^T @ x1^T
    #   rows [2H:3H) = wih_d^T @ x1^T
    proj = jnp.dot(w_in_ref[...], x_t, preferred_element_type=jnp.float32)  # (3H, Bm)
    xp0 = proj[:H]
    xp1 = proj[H:2 * H]
    dp0 = proj[2 * H:]

    beT = beT_ref[...]      # (H, 1) — implicit lane broadcast in the adds
    bdT = bdT_ref[...]
    bfT = bfT_ref[...]
    boutT = boutT_ref[...]  # (F, 1)

    # --- encoder recurrence (h0 = 0, so step 0 has no recurrent matmul) ------
    h = jnp.tanh(xp0 + beT)
    h = jnp.tanh(xp1 + beT +
                 jnp.dot(whh_eT_ref[...], h, preferred_element_type=jnp.float32))

    # --- decoder step 0 (input projection precomputed above) -----------------
    h0 = jnp.tanh(dp0 + bdT +
                  jnp.dot(whh_dT_ref[...], h, preferred_element_type=jnp.float32))

    # --- decoder step 1: algebraic fusion of the o0 feedback -----------------
    #   h1 = tanh(h0 @ (wout@wih_d + whh_d) + (bd + bout@wih_d))
    h1 = jnp.tanh(jnp.dot(wfT_ref[...], h0, preferred_element_type=jnp.float32) + bfT)

    # --- readouts: lane-dense (full 128-lane) stores into the output slab ----
    woutT = woutT_ref[...]
    y_ref[:F, :] = jnp.dot(woutT, h0, preferred_element_type=jnp.float32) + boutT
    y_ref[F:, :] = jnp.dot(woutT, h1, preferred_element_type=jnp.float32) + boutT


def encoder_decoder_forward(x, params, block_b=2048):
    """x: (B, 4, F) float32 -> (B, 2, F) float32."""
    B, T, F = x.shape
    assert T >= 2
    H = params["whh_e"].shape[0]
    f32 = jnp.float32

    # Batch-in-lanes layout: only the first two points are ever read; present
    # them as a (2F, B) slab with the batch on the lane axis.
    x_t = x[:, :2, :].reshape(B, 2 * F).T.astype(f32)          # (2F, B)

    # Batch tile: multiple of 128 lanes, as large as requested.  VMEM is not a
    # constraint here (an (8, 8192) f32 tile is 256 KiB, double-buffered).
    Bm = _round_up(min(block_b, max(B, 1)), 128)
    Bp = _round_up(B, Bm)
    if Bp != B:
        x_t = jnp.pad(x_t, ((0, 0), (0, Bp - B)))

    wih_eT = params["wih_e"].T.astype(f32)                     # (H, F)
    wih_dT = params["wih_d"].T.astype(f32)                     # (H, F)
    whh_eT = params["whh_e"].T.astype(f32)                     # (H, H)
    whh_dT = params["whh_d"].T.astype(f32)                     # (H, H)
    beT = params["be"].T.astype(f32)                           # (H, 1)
    bdT = params["bd"].T.astype(f32)                           # (H, 1)
    woutT = params["wout"].T.astype(f32)                       # (F, H)
    boutT = params["bout"].T.astype(f32)                       # (F, 1)

    # Block-structured fused input-projection weight (built once, tiny).
    z = jnp.zeros((H, F), f32)
    w_in = jnp.concatenate([
        jnp.concatenate([wih_eT, z], axis=1),                  # -> wih_e^T @ x0
        jnp.concatenate([z, wih_eT], axis=1),                  # -> wih_e^T @ x1
        jnp.concatenate([z, wih_dT], axis=1),                  # -> wih_d^T @ x1
    ], axis=0)                                                 # (3H, 2F)

    # Algebraic fusion of decoder step 1 (o0 fed back as the next input).
    wfT = wih_dT @ woutT + whh_dT                              # (H, H)
    bfT = bdT + wih_dT @ boutT                                 # (H, 1)

    def resident(shape):
        # Full-array block, constant index_map -> fetched once, VMEM-resident.
        return pl.BlockSpec(shape, lambda i: (0,) * len(shape))

    kernel = partial(_seq2seq_kernel, n_features=F, hidden=H)

    y_t = pl.pallas_call(
        kernel,
        out_shape=jax.ShapeDtypeStruct((2 * F, Bp), jnp.float32),
        grid=(Bp // Bm,),
        in_specs=[
            pl.BlockSpec((2 * F, Bm), lambda i: (0, i)),       # x tile (pipelined)
            resident((3 * H, 2 * F)),                          # fused input-proj weight
            resident((H, H)),                                  # whh_e^T
            resident((H, 1)),                                  # be^T
            resident((H, H)),                                  # whh_d^T
            resident((H, 1)),                                  # bd^T
            resident((H, H)),                                  # fused step-1 weight
            resident((H, 1)),                                  # fused step-1 bias
            resident((F, H)),                                  # wout^T
            resident((F, 1)),                                  # bout^T
        ],
        out_specs=pl.BlockSpec((2 * F, Bm), lambda i: (0, i)),
        compiler_params=pltpu.CompilerParams(
            dimension_semantics=("parallel",),                 # shards batch tiles on v7x
        ),
    )(x_t, w_in, whh_eT, beT, whh_dT, bdT, wfT, bfT, woutT, boutT)

    # (2F, Bp) -> (B, 2, F)
    return y_t[:, :B].T.reshape(B, 2, F)


def reference_forward(x, p):
    """Pure-JAX replica of the PyTorch forward (per-sequence loops vectorized)."""
    B = x.shape[0]
    H = p["whh_e"].shape[0]
    h = jnp.zeros((B, H), jnp.float32)
    for t in range(2):
        h = jnp.tanh(x[:, t, :] @ p["wih_e"] + h @ p["whh_e"] + p["be"])
    inp = x[:, 1, :]
    outs = []
    for _ in range(2):
        h = jnp.tanh(inp @ p["wih_d"] + h @ p["whh_d"] + p["bd"])
        out = h @ p["wout"] + p["bout"]
        outs.append(out)
        inp = out
    return jnp.stack(outs, axis=1)


def make_params(key, n_features, hidden):
    ks = jax.random.split(key, 8)
    s = 0.1
    return {
        "wih_e": s * jax.random.normal(ks[0], (n_features, hidden), jnp.float32),
        "whh_e": s * jax.random.normal(ks[1], (hidden, hidden), jnp.float32),
        "be":    s * jax.random.normal(ks[2], (1, hidden), jnp.float32),
        "wih_d": s * jax.random.normal(ks[3], (n_features, hidden), jnp.float32),
        "whh_d": s * jax.random.normal(ks[4], (hidden, hidden), jnp.float32),
        "bd":    s * jax.random.normal(ks[5], (1, hidden), jnp.float32),
        "wout":  s * jax.random.normal(ks[6], (hidden, n_features), jnp.float32),
        "bout":  s * jax.random.normal(ks[7], (1, n_features), jnp.float32),
    }


if __name__ == "__main__":
    # 4 points per sequence, F features per point, hidden size H.
    # Bm=256 with B=512 -> 2 parallel grid steps (uses both TCs on v7x).
    B, T, F, H = 512, 4, 4, 32
    key = jax.random.PRNGKey(0)
    kx, kp = jax.random.split(key)
    x = jax.random.normal(kx, (B, T, F), jnp.float32)
    params = make_params(kp, F, H)

    fwd = jax.jit(lambda xx: encoder_decoder_forward(xx, params, block_b=256))
    y = jax.block_until_ready(fwd(x))

    y_ref = reference_forward(x, params)
    assert y.shape == (B, 2, F)
    assert jnp.allclose(y, y_ref, atol=1e-5, rtol=1e-4), "mismatch vs pure-JAX reference"

    # Non-divisible batch (exercises the lane-padding path + multi-step grid).
    xb = x[:300]
    yb = jax.block_until_ready(encoder_decoder_forward(xb, params, block_b=128))
    assert jnp.allclose(yb, reference_forward(xb, params), atol=1e-5, rtol=1e-4)

    print("KERNEL_OK")
</pallas_src>

<mosaic_0001>
module attributes {stable_mosaic.version = 11 : i64} {
  func.func @_seq2seq_kernel(%arg0: i32, %arg1: memref<8x256xf32, #tpu.memory_space<vmem>>, %arg2: memref<96x8xf32, #tpu.memory_space<vmem>>, %arg3: memref<32x32xf32, #tpu.memory_space<vmem>>, %arg4: memref<32x1xf32, #tpu.memory_space<vmem>>, %arg5: memref<32x32xf32, #tpu.memory_space<vmem>>, %arg6: memref<32x1xf32, #tpu.memory_space<vmem>>, %arg7: memref<32x32xf32, #tpu.memory_space<vmem>>, %arg8: memref<32x1xf32, #tpu.memory_space<vmem>>, %arg9: memref<4x32xf32, #tpu.memory_space<vmem>>, %arg10: memref<4x1xf32, #tpu.memory_space<vmem>>, %arg11: memref<8x256xf32, #tpu.memory_space<vmem>>) attributes {dimension_semantics = [#tpu.dimension_semantics<parallel>], iteration_bounds = array<i64: 2>, scalar_prefetch = 0 : i64, scratch_operands = 0 : i64, tpu.core_type = #tpu.core_type<tc>, window_params = [{transform_indices = @transform_0, window_bounds = array<i64: 8, 256>}, {pipeline_mode = #tpu.pipeline_mode<synchronous>, transform_indices = @transform_1, window_bounds = array<i64: 96, 8>}, {pipeline_mode = #tpu.pipeline_mode<synchronous>, transform_indices = @transform_2, window_bounds = array<i64: 32, 32>}, {pipeline_mode = #tpu.pipeline_mode<synchronous>, transform_indices = @transform_3, window_bounds = array<i64: 32, 1>}, {pipeline_mode = #tpu.pipeline_mode<synchronous>, transform_indices = @transform_4, window_bounds = array<i64: 32, 32>}, {pipeline_mode = #tpu.pipeline_mode<synchronous>, transform_indices = @transform_5, window_bounds = array<i64: 32, 1>}, {pipeline_mode = #tpu.pipeline_mode<synchronous>, transform_indices = @transform_6, window_bounds = array<i64: 32, 32>}, {pipeline_mode = #tpu.pipeline_mode<synchronous>, transform_indices = @transform_7, window_bounds = array<i64: 32, 1>}, {pipeline_mode = #tpu.pipeline_mode<synchronous>, transform_indices = @transform_8, window_bounds = array<i64: 4, 32>}, {pipeline_mode = #tpu.pipeline_mode<synchronous>, transform_indices = @transform_9, window_bounds = array<i64: 4, 1>}, {transform_indices = @transform_10, window_bounds = array<i64: 8, 256>}]} {
    %c0 = arith.constant 0 : index
    %c0_0 = arith.constant 0 : index
    %0 = vector.load %arg1[%c0, %c0_0] : memref<8x256xf32, #tpu.memory_space<vmem>>, vector<8x256xf32>
    %c0_1 = arith.constant 0 : index
    %c0_2 = arith.constant 0 : index
    %1 = vector.load %arg2[%c0_1, %c0_2] : memref<96x8xf32, #tpu.memory_space<vmem>>, vector<96x8xf32>
    %cst = arith.constant dense<0.000000e+00> : vector<96x256xf32>
    %2 = tpu.matmul %1, %0, %cst {dimension_numbers = #tpu.dot_dimension_numbers<[1], [0], [0], [1], [0, 0, 1, 1], [], []>} : vector<96x8xf32>, vector<8x256xf32>, vector<96x256xf32> -> vector<96x256xf32>
    %3 = vector.extract_strided_slice %2 {offsets = [0, 0], sizes = [32, 256], strides = [1, 1]} : vector<96x256xf32> to vector<32x256xf32>
    %4 = vector.extract_strided_slice %2 {offsets = [32, 0], sizes = [32, 256], strides = [1, 1]} : vector<96x256xf32> to vector<32x256xf32>
    %5 = vector.extract_strided_slice %2 {offsets = [64, 0], sizes = [32, 256], strides = [1, 1]} : vector<96x256xf32> to vector<32x256xf32>
    %c0_3 = arith.constant 0 : index
    %c0_4 = arith.constant 0 : index
    %6 = vector.load %arg4[%c0_3, %c0_4] : memref<32x1xf32, #tpu.memory_space<vmem>>, vector<32x1xf32>
    %c0_5 = arith.constant 0 : index
    %c0_6 = arith.constant 0 : index
    %7 = vector.load %arg6[%c0_5, %c0_6] : memref<32x1xf32, #tpu.memory_space<vmem>>, vector<32x1xf32>
    %c0_7 = arith.constant 0 : index
    %c0_8 = arith.constant 0 : index
    %8 = vector.load %arg8[%c0_7, %c0_8] : memref<32x1xf32, #tpu.memory_space<vmem>>, vector<32x1xf32>
    %c0_9 = arith.constant 0 : index
    %c0_10 = arith.constant 0 : index
    %9 = vector.load %arg10[%c0_9, %c0_10] : memref<4x1xf32, #tpu.memory_space<vmem>>, vector<4x1xf32>
    %10 = vector.broadcast %6 : vector<32x1xf32> to vector<32x256xf32>
    %11 = arith.addf %3, %10 : vector<32x256xf32>
    %12 = math.tanh %11 : vector<32x256xf32>
    %13 = vector.broadcast %6 : vector<32x1xf32> to vector<32x256xf32>
    %14 = arith.addf %4, %13 : vector<32x256xf32>
    %c0_11 = arith.constant 0 : index
    %c0_12 = arith.constant 0 : index
    %15 = vector.load %arg3[%c0_11, %c0_12] : memref<32x32xf32, #tpu.memory_space<vmem>>, vector<32x32xf32>
    %cst_13 = arith.constant dense<0.000000e+00> : vector<32x256xf32>
    %16 = tpu.matmul %15, %12, %cst_13 {dimension_numbers = #tpu.dot_dimension_numbers<[1], [0], [0], [1], [0, 0, 1, 1], [], []>} : vector<32x32xf32>, vector<32x256xf32>, vector<32x256xf32> -> vector<32x256xf32>
    %17 = arith.addf %14, %16 : vector<32x256xf32>
    %18 = math.tanh %17 : vector<32x256xf32>
    %19 = vector.broadcast %7 : vector<32x1xf32> to vector<32x256xf32>
    %20 = arith.addf %5, %19 : vector<32x256xf32>
    %c0_14 = arith.constant 0 : index
    %c0_15 = arith.constant 0 : index
    %21 = vector.load %arg5[%c0_14, %c0_15] : memref<32x32xf32, #tpu.memory_space<vmem>>, vector<32x32xf32>
    %cst_16 = arith.constant dense<0.000000e+00> : vector<32x256xf32>
    %22 = tpu.matmul %21, %18, %cst_16 {dimension_numbers = #tpu.dot_dimension_numbers<[1], [0], [0], [1], [0, 0, 1, 1], [], []>} : vector<32x32xf32>, vector<32x256xf32>, vector<32x256xf32> -> vector<32x256xf32>
    %23 = arith.addf %20, %22 : vector<32x256xf32>
    %24 = math.tanh %23 : vector<32x256xf32>
    %c0_17 = arith.constant 0 : index
    %c0_18 = arith.constant 0 : index
    %25 = vector.load %arg7[%c0_17, %c0_18] : memref<32x32xf32, #tpu.memory_space<vmem>>, vector<32x32xf32>
    %cst_19 = arith.constant dense<0.000000e+00> : vector<32x256xf32>
    %26 = tpu.matmul %25, %24, %cst_19 {dimension_numbers = #tpu.dot_dimension_numbers<[1], [0], [0], [1], [0, 0, 1, 1], [], []>} : vector<32x32xf32>, vector<32x256xf32>, vector<32x256xf32> -> vector<32x256xf32>
    %27 = vector.broadcast %8 : vector<32x1xf32> to vector<32x256xf32>
    %28 = arith.addf %26, %27 : vector<32x256xf32>
    %29 = math.tanh %28 : vector<32x256xf32>
    %c0_20 = arith.constant 0 : index
    %c0_21 = arith.constant 0 : index
    %30 = vector.load %arg9[%c0_20, %c0_21] : memref<4x32xf32, #tpu.memory_space<vmem>>, vector<4x32xf32>
    %cst_22 = arith.constant dense<0.000000e+00> : vector<4x256xf32>
    %31 = tpu.matmul %30, %24, %cst_22 {dimension_numbers = #tpu.dot_dimension_numbers<[1], [0], [0], [1], [0, 0, 1, 1], [], []>} : vector<4x32xf32>, vector<32x256xf32>, vector<4x256xf32> -> vector<4x256xf32>
    %32 = vector.broadcast %9 : vector<4x1xf32> to vector<4x256xf32>
    %33 = arith.addf %31, %32 : vector<4x256xf32>
    %c0_23 = arith.constant 0 : index
    %c0_24 = arith.constant 0 : index
    %34 = vector.load %arg11[%c0_23, %c0_24] : memref<8x256xf32, #tpu.memory_space<vmem>>, vector<4x256xf32>
    tpu.vector_store %arg11[%c0_23, %c0_24], %33 {strides = array<i32>} : memref<8x256xf32, #tpu.memory_space<vmem>>, vector<4x256xf32>,
    %cst_25 = arith.constant dense<0.000000e+00> : vector<4x256xf32>
    %35 = tpu.matmul %30, %29, %cst_25 {dimension_numbers = #tpu.dot_dimension_numbers<[1], [0], [0], [1], [0, 0, 1, 1], [], []>} : vector<4x32xf32>, vector<32x256xf32>, vector<4x256xf32> -> vector<4x256xf32>
    %36 = vector.broadcast %9 : vector<4x1xf32> to vector<4x256xf32>
    %37 = arith.addf %35, %36 : vector<4x256xf32>
    %c4 = arith.constant 4 : index
    %c0_26 = arith.constant 0 : index
    %38 = vector.load %arg11[%c4, %c0_26] : memref<8x256xf32, #tpu.memory_space<vmem>>, vector<4x256xf32>
    tpu.vector_store %arg11[%c4, %c0_26], %37 {strides = array<i32>} : memref<8x256xf32, #tpu.memory_space<vmem>>, vector<4x256xf32>,
    return
  }
  func.func @transform_0(%arg0: i32) -> (i32, i32) {
    %c0_i32 = arith.constant 0 : i32
    %c0_i32_0 = arith.constant 0 : i32
    return %c0_i32, %arg0 : i32, i32
  }
  func.func @transform_1(%arg0: i32) -> (i32, i32) {
    %c0_i32 = arith.constant 0 : i32
    %c0_i32_0 = arith.constant 0 : i32
    %c0_i32_1 = arith.constant 0 : i32
    return %c0_i32, %c0_i32_0 : i32, i32
  }
  func.func @transform_2(%arg0: i32) -> (i32, i32) {
    %c0_i32 = arith.constant 0 : i32
    %c0_i32_0 = arith.constant 0 : i32
    %c0_i32_1 = arith.constant 0 : i32
    return %c0_i32, %c0_i32_0 : i32, i32
  }
  func.func @transform_3(%arg0: i32) -> (i32, i32) {
    %c0_i32 = arith.constant 0 : i32
    %c0_i32_0 = arith.constant 0 : i32
    %c0_i32_1 = arith.constant 0 : i32
    return %c0_i32, %c0_i32_0 : i32, i32
  }
  func.func @transform_4(%arg0: i32) -> (i32, i32) {
    %c0_i32 = arith.constant 0 : i32
    %c0_i32_0 = arith.constant 0 : i32
    %c0_i32_1 = arith.constant 0 : i32
    return %c0_i32, %c0_i32_0 : i32, i32
  }
  func.func @transform_5(%arg0: i32) -> (i32, i32) {
    %c0_i32 = arith.constant 0 : i32
    %c0_i32_0 = arith.constant 0 : i32
    %c0_i32_1 = arith.constant 0 : i32
    return %c0_i32, %c0_i32_0 : i32, i32
  }
  func.func @transform_6(%arg0: i32) -> (i32, i32) {
    %c0_i32 = arith.constant 0 : i32
    %c0_i32_0 = arith.constant 0 : i32
    %c0_i32_1 = arith.constant 0 : i32
    return %c0_i32, %c0_i32_0 : i32, i32
  }
  func.func @transform_7(%arg0: i32) -> (i32, i32) {
    %c0_i32 = arith.constant 0 : i32
    %c0_i32_0 = arith.constant 0 : i32
    %c0_i32_1 = arith.constant 0 : i32
    return %c0_i32, %c0_i32_0 : i32, i32
  }
  func.func @transform_8(%arg0: i32) -> (i32, i32) {
    %c0_i32 = arith.constant 0 : i32
    %c0_i32_0 = arith.constant 0 : i32
    %c0_i32_1 = arith.constant 0 : i32
    return %c0_i32, %c0_i32_0 : i32, i32
  }
  func.func @transform_9(%arg0: i32) -> (i32, i32) {
    %c0_i32 = arith.constant 0 : i32
    %c0_i32_0 = arith.constant 0 : i32
    %c0_i32_1 = arith.constant 0 : i32
    return %c0_i32, %c0_i32_0 : i32, i32
  }
  func.func @transform_10(%arg0: i32) -> (i32, i32) {
    %c0_i32 = arith.constant 0 : i32
    %c0_i32_0 = arith.constant 0 : i32
    return %c0_i32, %arg0 : i32, i32
  }
}

</mosaic_0001>

<bundles_post_ra>
// kernel: _lambda_.1
= control target key start
LH: loop header
LB: loop body
LE: loop exit
PB: predicated region body
PF: predicated region fallthrough
CT: control target
= control target key end

     0   :  { %15 = vsyncpa [#allocation3], 0  ;;  %s2355_s0 = inlined_call_operand.vmem [shape: f32[8,512], index: 0, kind: input, shape index: {}]   ;;  %s2356_s1 = inlined_call_operand.vmem [shape: f32[96,8], index: 1, kind: input, shape index: {}]   ;;  %s2357_s2 = inlined_call_operand.hbm [shape: f32[32,32], index: 2, kind: input, shape index: {}]   ;;  %s2358_s3 = inlined_call_operand.hbm [shape: f32[32,1], index: 3, kind: input, shape index: {}]   ;;  %s2359_s4 = inlined_call_operand.hbm [shape: f32[32,32], index: 4, kind: input, shape index: {}]   ;;  %s2360_s5 = inlined_call_operand.hbm [shape: f32[32,1], index: 5, kind: input, shape index: {}]   ;;  %s2361_s6 = inlined_call_operand.hbm [shape: f32[32,32], index: 6, kind: input, shape index: {}]   ;;  %s2362_s7 = inlined_call_operand.vmem [shape: f32[32,1], index: 7, kind: input, shape index: {}]   ;;  %s2363_s8 = inlined_call_operand.hbm [shape: f32[4,32], index: 8, kind: input, shape index: {}]   ;;  %s2364_s9 = inlined_call_operand.hbm [shape: f32[4,1], index: 9, kind: input, shape index: {}]   ;;  %s2365_s10 = inlined_call_operand.vmem [shape: f32[8,512], index: 10, kind: output, shape index: {}]  }
   0x1   :  { %16 = vsyncpa [#allocation5], 0 }
   0x2   :  { %17 = vsyncpa [#allocation8], 0 }
   0x3   :  { %18 = vsyncpa [#allocation11], 0  ;;  %s1956_s13 = smov 0  }
   0x4 LB: > { %s2366_s14 = sadd.s32 4294967295, %s1888_s13   ;;  %p1398_p0 = scmp.ge.s32.totalorder %s1888_s13, 1  ;;  %s1888_s13 = sphi %s1956_s13, %s24_s13  }
   0x5   : > { %p270_p1 = scmp.lt.s32.totalorder %s1888_s13, 3  ;;  %p1966_p2 = scmp.eq.s32.totalorder %s2366_s14, 0 }
   0x6   : > { %s1890_s17 = smov [#allocation4]   ;;  %s1891_s19 = smov [#allocation7]  }
   0x7   : > { %s2370_s15 = scalar_select %p1966_p2, 1, 0 }
   0x8   : > { %p1970_p3 = pnand %p1398_p0, %p270_p1  ;;  %s298_s18 = sshll.u32 %s1890_s17, 4  ;;  %s1974_s18 = int_to_ptr.vmem [resolvable:$true] %s298_s18 }
   0x9   : > { %s324_s20 = sshll.u32 %s1891_s19, 4  ;;  %s1892_s22 = smov [#allocation10]   ;;  %s1978_s20 = int_to_ptr.vmem [resolvable:$true] %s324_s20 }
   0xa   : > { %s2371_s16 = scalar_select %p1970_p3, 1, 0 }
   0xb   : > { %p1549_p4 = pneg %p1970_p3  ;;  %s354_s23 = sshll.u32 %s1892_s22, 4  ;;  %s1986_s23 = int_to_ptr.vmem [resolvable:$true] %s354_s23 }
   0xc   : > { %s1893_s24 = smov [#allocation2]   ;;  %s1670_s28 = scalar_lea.hbm %s2358_s3, 512 }
   0xd   : > { %p1982_p5 = pnand %p1966_p2, %p1549_p4  ;;  %s1988_s25 = sshll.u32 %s1893_s24, 4  ;;  %s286_s25 = int_to_ptr.vmem [resolvable:$true] %s1988_s25 }
   0xe   : > { %p1671_p6 = scmp.ne.s32.totalorder %s2358_s3, %s1670_s28  ;;  %p1677_p10 = scmp.lt.u32.totalorder %s1670_s28, %s2358_s3 }
   0xf   : > { %p1998_p7 = pneg %p1982_p5 }
  0x11   : > { %p1673_p8 = pnand %p1998_p7, %p1671_p6 }
  0x13   : > { %p1674_p9 = pneg %p1673_p8 }
  0x15   : > { %p1679_p11 = pnand %p1677_p10, %p1674_p9 }
  0x17   : > { %1682 = shalt.err (!%p1679_p11)
}
  0x18   : > { %s1683_s19 = scalar_lea.vmem %s1974_s18, 512  ;;  %p1691_p1 = scmp.lt.s32.totalorder %s1974_s18, %s1974_s18 }
  0x19   : > { %p1684_p12 = scmp.ne.s32.totalorder %s1974_s18, %s1683_s19  ;;  %p1692_p4 = scmp.lt.s32.totalorder %s1683_s19, %s1683_s19 }
  0x1b   : > { %p1686_p13 = pnand %p1684_p12, %p1998_p7  ;;  %p1693_p6 = por %p1692_p4, %p1691_p1 }
  0x1d   : > { %p1687_p0 = pneg %p1686_p13 }
  0x1f   : > { %p1694_p8 = pnand %p1693_p6, %p1687_p0 }
  0x21   : > { %1697 = shalt.err (!%p1694_p8)
}
  0x22   : > { %s1894_s22 = smov 128   ;;  %s1895_s24 = smov 8  }
  0x23   : > { %1555 = dma.hbm_to_vmem [thread:$0]  (!%p1982_p5), %s2358_s3, 512, %s1974_s18, [#allocation5], %s1894_s22, %s1894_s22, %s1895_s24  }
  0x24   : > { %s1698_s30 = scalar_lea.hbm %s2360_s5, 512 }
  0x25   : > { %p1699_p9 = scmp.ne.s32.totalorder %s2360_s5, %s1698_s30  ;;  %p1705_p12 = scmp.lt.u32.totalorder %s1698_s30, %s2360_s5 }
  0x27   : > { %p1701_p10 = pnand %p1699_p9, %p1998_p7 }
  0x29   : > { %p1702_p11 = pneg %p1701_p10 }
  0x2b   : > { %p1707_p13 = pnand %p1705_p12, %p1702_p11 }
  0x2d   : > { %1710 = shalt.err (!%p1707_p13)
}
  0x2e   : > { %s1711_s18 = scalar_lea.vmem %s1978_s20, 512  ;;  %p1719_p6 = scmp.lt.s32.totalorder %s1978_s20, %s1978_s20 }
  0x2f   : > { %p1712_p0 = scmp.ne.s32.totalorder %s1978_s20, %s1711_s18  ;;  %p1720_p8 = scmp.lt.s32.totalorder %s1711_s18, %s1711_s18 }
  0x31   : > { %p1714_p1 = pnand %p1712_p0, %p1998_p7  ;;  %p1721_p9 = por %p1720_p8, %p1719_p6 }
  0x33   : > { %p1715_p4 = pneg %p1714_p1 }
  0x35   : > { %p1722_p10 = pnand %p1721_p9, %p1715_p4 }
  0x37   : > { %1725 = shalt.err (!%p1722_p10)
}
  0x38   : > { %1561 = dma.hbm_to_vmem [thread:$0]  (!%p1982_p5), %s2360_s5, 512, %s1978_s20, [#allocation8], %s1894_s22, %s1894_s22, %s1895_s24  }
  0x39   : > { %s1726_s29 = scalar_lea.hbm %s2363_s8, 64 }
  0x3a   : > { %p1727_p11 = scmp.ne.s32.totalorder %s2363_s8, %s1726_s29  ;;  %p1733_p0 = scmp.lt.u32.totalorder %s1726_s29, %s2363_s8 }
  0x3c   : > { %p1729_p12 = pnand %p1727_p11, %p1998_p7 }
  0x3e   : > { %p1730_p13 = pneg %p1729_p12 }
  0x40   : > { %p1735_p1 = pnand %p1733_p0, %p1730_p13 }
  0x42   : > { %1738 = shalt.err (!%p1735_p1)
}
  0x43   : > { %s1739_s20 = scalar_lea.vmem %s1986_s23, 64  ;;  %p1747_p9 = scmp.lt.s32.totalorder %s1986_s23, %s1986_s23 }
  0x44   : > { %p1740_p4 = scmp.ne.s32.totalorder %s1986_s23, %s1739_s20  ;;  %p1748_p10 = scmp.lt.s32.totalorder %s1739_s20, %s1739_s20 }
  0x46   : > { %p1742_p6 = pnand %p1740_p4, %p1998_p7  ;;  %p1749_p11 = por %p1748_p10, %p1747_p9 }
  0x48   : > { %p1743_p8 = pneg %p1742_p6 }
  0x4a   : > { %p1750_p12 = pnand %p1749_p11, %p1743_p8 }
  0x4c   : > { %1753 = shalt.err (!%p1750_p12)
}
  0x4d   : > { %1567 = dma.hbm_to_vmem [thread:$0]  (!%p1982_p5), %s2363_s8, 64, %s1986_s23, [#allocation11]  }
  0x4e   : > { %s1754_s28 = scalar_lea.hbm %s2357_s2, 512 }
  0x4f   : > { %p1755_p13 = scmp.ne.s32.totalorder %s2357_s2, %s1754_s28  ;;  %p1761_p4 = scmp.lt.u32.totalorder %s1754_s28, %s2357_s2 }
  0x51   : > { %p1757_p0 = pnand %p1755_p13, %p1998_p7 }
  0x53   : > { %p1758_p1 = pneg %p1757_p0 }
  0x55   : > { %p1763_p6 = pnand %p1761_p4, %p1758_p1 }
  0x57   : > { %1766 = shalt.err (!%p1763_p6)
}
  0x58   : > { %s1767_s19 = scalar_lea.vmem %s286_s25, 512  ;;  %p1775_p11 = scmp.lt.s32.totalorder %s286_s25, %s286_s25 }
  0x59   : > { %p1768_p8 = scmp.ne.s32.totalorder %s286_s25, %s1767_s19  ;;  %p1776_p12 = scmp.lt.s32.totalorder %s1767_s19, %s1767_s19 }
  0x5b   : > { %p1770_p9 = pnand %p1768_p8, %p1998_p7  ;;  %p1777_p2 = por %p1776_p12, %p1775_p11 }
  0x5d   : > { %p1771_p10 = pneg %p1770_p9 }
  0x5f   : > { %p1778_p3 = pnand %p1777_p2, %p1771_p10 }
  0x61   : > { %1781 = shalt.err (!%p1778_p3)
}
  0x62   : > { %1552 = dma.hbm_to_vmem [thread:$0]  (!%p1982_p5), %s2357_s2, 512, %s286_s25, [#allocation3], %s1894_s22, %s1894_s22, %s1895_s24  }
  0x63   : > { %s1896_s18 = smov [#allocation6]   ;;  %s1897_s26 = smov [#allocation9]  }
  0x64   : > { %s311_s14 = sshll.u32 %s1896_s18, 4  ;;  %s337_s27 = sshll.u32 %s1897_s26, 4  ;;  %s312_s14 = int_to_ptr.vmem [resolvable:$true] %s311_s14  ;;  %s338_s27 = int_to_ptr.vmem [resolvable:$true] %s337_s27 }
  0x65   : > { %s1782_s30 = scalar_lea.hbm %s2359_s4, 512 }
  0x66   : > { %p1783_p2 = scmp.ne.s32.totalorder %s2359_s4, %s1782_s30  ;;  %p1789_p0 = scmp.lt.u32.totalorder %s1782_s30, %s2359_s4 }
  0x68   : > { %p1785_p3 = pnand %p1783_p2, %p1998_p7 }
  0x6a   : > { %p1786_p13 = pneg %p1785_p3 }
  0x6c   : > { %p1791_p1 = pnand %p1789_p0, %p1786_p13 }
  0x6e   : > { %1794 = shalt.err (!%p1791_p1)
}
  0x6f   : > { %s1795_s25 = scalar_lea.vmem %s312_s14, 512  ;;  %p1803_p9 = scmp.lt.s32.totalorder %s312_s14, %s312_s14 }
  0x70   : > { %p1796_p4 = scmp.ne.s32.totalorder %s312_s14, %s1795_s25  ;;  %p1804_p10 = scmp.lt.s32.totalorder %s1795_s25, %s1795_s25 }
  0x72   : > { %p1798_p6 = pnand %p1796_p4, %p1998_p7  ;;  %p1805_p11 = por %p1804_p10, %p1803_p9 }
  0x74   : > { %p1799_p8 = pneg %p1798_p6 }
  0x76   : > { %p1806_p12 = pnand %p1805_p11, %p1799_p8 }
  0x78   : > { %1809 = shalt.err (!%p1806_p12)
}
  0x79   : > { %1558 = dma.hbm_to_vmem [thread:$0]  (!%p1982_p5), %s2359_s4, 512, %s312_s14, [#allocation5], %s1894_s22, %s1894_s22, %s1895_s24  }
  0x7a   : > { %s1810_s29 = scalar_lea.hbm %s2361_s6, 512 }
  0x7b   : > { %p1811_p2 = scmp.ne.s32.totalorder %s2361_s6, %s1810_s29  ;;  %p1817_p0 = scmp.lt.u32.totalorder %s1810_s29, %s2361_s6 }
  0x7d   : > { %p1813_p3 = pnand %p1811_p2, %p1998_p7 }
  0x7f   : > { %p1814_p13 = pneg %p1813_p3 }
  0x81   : > { %p1819_p1 = pnand %p1817_p0, %p1814_p13 }
  0x83   : > { %1822 = shalt.err (!%p1819_p1)
}
  0x84   : > { %s1823_s23 = scalar_lea.vmem %s338_s27, 512  ;;  %p1831_p9 = scmp.lt.s32.totalorder %s338_s27, %s338_s27 }
  0x85   : > { %p1824_p4 = scmp.ne.s32.totalorder %s338_s27, %s1823_s23  ;;  %p1832_p10 = scmp.lt.s32.totalorder %s1823_s23, %s1823_s23 }
  0x87   : > { %p1826_p6 = pnand %p1824_p4, %p1998_p7  ;;  %p1833_p11 = por %p1832_p10, %p1831_p9 }
  0x89   : > { %p1827_p8 = pneg %p1826_p6 }
  0x8b   : > { %p1834_p12 = pnand %p1833_p11, %p1827_p8 }
  0x8d   : > { %1837 = shalt.err (!%p1834_p12)
}
  0x8e   : > { %1564 = dma.hbm_to_vmem [thread:$0]  (!%p1982_p5), %s2361_s6, 512, %s338_s27, [#allocation8], %s1894_s22, %s1894_s22, %s1895_s24  }
  0x8f   : > { %s1898_s20 = smov [#allocation12]   ;;  %s1838_s29 = scalar_lea.hbm %s2364_s9, 64 }
  0x90   : > { %s365_s18 = sshll.u32 %s1898_s20, 4  ;;  %p1839_p2 = scmp.ne.s32.totalorder %s2364_s9, %s1838_s29  ;;  %s366_s18 = int_to_ptr.vmem [resolvable:$true] %s365_s18 }
  0x91   : > { %p1845_p0 = scmp.lt.u32.totalorder %s1838_s29, %s2364_s9 }
  0x92   : > { %p1841_p3 = pnand %p1839_p2, %p1998_p7 }
  0x94   : > { %p1842_p13 = pneg %p1841_p3 }
  0x96   : > { %p1847_p1 = pnand %p1845_p0, %p1842_p13 }
  0x98   : > { %1850 = shalt.err (!%p1847_p1)
}
  0x99   : > { %s1851_s22 = scalar_lea.vmem %s366_s18, 64  ;;  %p1859_p9 = scmp.lt.s32.totalorder %s366_s18, %s366_s18 }
  0x9a   : > { %p1852_p4 = scmp.ne.s32.totalorder %s366_s18, %s1851_s22  ;;  %p1860_p10 = scmp.lt.s32.totalorder %s1851_s22, %s1851_s22 }
  0x9c   : > { %p1854_p6 = pnand %p1852_p4, %p1998_p7  ;;  %p1861_p11 = por %p1860_p10, %p1859_p9 }
  0x9e   : > { %p1855_p8 = pneg %p1854_p6 }
  0xa0   : > { %p1862_p12 = pnand %p1861_p11, %p1855_p8 }
  0xa2   : > { %1865 = shalt.err (!%p1862_p12)
}
  0xa3   : > { %1570 = dma.hbm_to_vmem [thread:$0]  (!%p1982_p5), %s2364_s9, 64, %s366_s18, [#allocation11]  }
  0xa4   : > { %p2374_p2 = scmp.ne.s32.totalorder %s2371_s16, 0 }
  0xa5   : > { %p2375_p3 = scmp.ne.s32.totalorder (!%p2374_p2), %s2370_s15, 0 }
  0xa6   : > { %387 = sbr.rel (%p2374_p2) target bundleno = 1384 (0x568), region = 60 }
  0xad   : > { %1871 = dma.done.wait (%p2375_p3), [#allocation3], 512  }
  0xae   : > { %1873 = vsyncadd (%p2375_p3), [#allocation3], 4294966784 }
  0xaf   : > { %1875 = dma.done.wait (%p2375_p3), [#allocation5], 1024  }
  0xb0   : > { %1877 = vsyncadd (%p2375_p3), [#allocation5], 4294966272 }
  0xb1   : > { %1879 = dma.done.wait (%p2375_p3), [#allocation8], 1024  }
  0xb2   : > { %1881 = vsyncadd (%p2375_p3), [#allocation8], 4294966272 }
  0xb3   : > { %1883 = dma.done.wait (%p2375_p3), [#allocation11], 128  }
  0xb4   : > { %1885 = vsyncadd (%p2375_p3), [#allocation11], 4294967168  ;;  %s2376_s16 = sadd.s32 4294967295, %s1888_s13   ;;  %v1899_v0 = vmov 0.0   ;;  %v1900_v1 = vmov 0   ;;  %v463_v4 = vld [vmem:[%s2356_s1] sm:$0xff] }
  0xb5   : > { %s1415_s21 = sshll.u32 %s2376_s16, 1  ;;  %576 = vmatprep.mubr.f32.mxu0 %v1899_v0  ;;  %612 = vmatprep.mubr.f32.mxu1 %v1899_v0  ;;  %vm475_vm0 = vcmask 64512   ;;  %v469_v5 = vld [vmem:[%s2356_s1 + $0x30] sm:$0xff]  ;;  %v464_v6 = vld [vmem:[%s2356_s1 + $0x8] sm:$0xff]  ;;  %v470_v7 = vld [vmem:[%s2356_s1 + $0x38] sm:$0xff]  ;;  %vm710_vm1 = vcmask 261120  }
  0xb6   : > { %p450_p5 = scmp.lt.s32.totalorder %s1415_s21, 3  ;;  %1604 = vset.pattern.permute.xlu0 %v1900_v1  ;;  %1605 = vset.pattern.permute.xlu1 %v1900_v1  ;;  %v649_v8 = vld [vmem:[#allocation4] sm:$0xff]  ;;  %v651_v9 = vld [vmem:[#allocation4 + $0x10] sm:$0xff]  ;;  %v650_v10 = vld [vmem:[#allocation4 + $0x8] sm:$0xff] }
  0xb7   : > { %664 = vperm.xlu0 %1604, %v649_v8   ;;  %674 = vperm.xlu1 %1605, %v651_v9   ;;  %v652_v11 = vld [vmem:[#allocation4 + $0x18] sm:$0xff]  ;;  %v465_v12 = vld [vmem:[%s2356_s1 + $0x10] sm:$0xff]  ;;  %v471_v13 = vld [vmem:[%s2356_s1 + $0x40] sm:$0xff] }
  0xb8   : > { %s2378_s21 = smov (!%p450_p5, %s1415_s21), 3  ;;  %v653_v14 = vld [vmem:[#allocation7] sm:$0xff]  ;;  %v654_v15 = vld [vmem:[#allocation7 + $0x8] sm:$0xff]  ;;  %v466_v16 = vld [vmem:[%s2356_s1 + $0x18] sm:$0xff] }
  0xb9   : > { %s1416_s11 = sshll.u32 %s2378_s21, 3  ;;  %v472_v17 = vld [vmem:[%s2356_s1 + $0x48] sm:$0xff]  ;;  %v655_v18 = vld [vmem:[#allocation7 + $0x10] sm:$0xff]  ;;  %v656_v19 = vld [vmem:[#allocation7 + $0x18] sm:$0xff] }
  0xba   : > { %s453_s14 = scalar_lea.vmem %s2355_s0, %s1416_s11  ;;  %v473_v20 = vld [vmem:[%s2356_s1 + $0x50] sm:$0xff]  ;;  %v657_v21 = vld [vmem:[%s2362_s7] sm:$0xff]  ;;  %v658_v22 = vld [vmem:[%s2362_s7 + $0x8] sm:$0xff]  ;;  %s2345_s25 = scalar_lea.vmem %s2365_s10, %s1416_s11 }
  0xbb   : > { %v462_v2 = vld [vmem:[%s453_s14 + $0x8] sm:$0xff]  ;;  %v461_v3 = vld [vmem:[%s453_s14] sm:$0xff]  ;;  %669 = vperm.xlu0 %1604, %v650_v10   ;;  %679 = vperm.xlu1 %1605, %v652_v11   ;;  %v474_v23 = vld [vmem:[%s2356_s1 + $0x58] sm:$0xff] }
  0xbc   : > { %512 = vmatprep.subr.mxu0 %v462_v2  ;;  %1487 = vmatprep.subr.mxu1 %v462_v2  ;;  %v659_v24 = vld [vmem:[%s2362_s7 + $0x10] sm:$0xff]  ;;  %v660_v25 = vld [vmem:[%s2362_s7 + $0x18] sm:$0xff]  ;;  %v661_v26 = vld [vmem:[#allocation12] sm:$0xf] }
  0xbd   : > { %513 = vmatpush1.msra.mxu0 %v461_v3  ;;  %1488 = vmatpush1.msra.mxu1 %v461_v3  ;;  %v467_v27 = vld [vmem:[%s2356_s1 + $0x20] sm:$0xff]  ;;  %v468_v28 = vld [vmem:[%s2356_s1 + $0x28] sm:$0xff] }
  0xbe   : > { %1419 = vmatmul.mubr.msk.f32.vlgmr.msra.gmra.mrb[0].mxu0 %vm475_vm0, %v463_v4  ;;  %1425 = vmatmul.mubr.msk.f32.vlgmr.msra.gmra.mrb[0].mxu1 %vm475_vm0, %v469_v5  ;;  %v706_v10 = vld [vmem:[#allocation2] sm:$0xff]  ;;  %v707_v11 = vld [vmem:[#allocation2 + $0x8] sm:$0xff] }
  0xbf   : > { %582 = vmatprep.mubr.f32.mxu0 %v1899_v0  ;;  %618 = vmatprep.mubr.f32.mxu1 %v1899_v0 }
  0xc0   : > { %830 = vperm.xlu0 %1604, %v653_v14   ;;  %835 = vperm.xlu1 %1605, %v654_v15  }
  0xc2   : > { %1420 = vmatmul.mubr.msk.f32.gmra.mrb[2].mxu0 %vm475_vm0, %v464_v6  ;;  %1426 = vmatmul.mubr.msk.f32.gmra.mrb[2].mxu1 %vm475_vm0, %v470_v7 }
  0xc3   : > { %588 = vmatprep.mubr.f32.mxu0 %v1899_v0  ;;  %624 = vmatprep.mubr.f32.mxu1 %v1899_v0 }
  0xc4   : > { %840 = vperm.xlu0 %1604, %v655_v18   ;;  %845 = vperm.xlu1 %1605, %v656_v19  }
  0xc6   : > { %1421 = vmatmul.mubr.msk.f32.gmra.mrb[4].mxu0 %vm475_vm0, %v465_v12  ;;  %1427 = vmatmul.mubr.msk.f32.gmra.mrb[4].mxu1 %vm475_vm0, %v471_v13  ;;  %v708_v12 = vld [vmem:[#allocation2 + $0x10] sm:$0xff]  ;;  %v709_v13 = vld [vmem:[#allocation2 + $0x18] sm:$0xff] }
  0xc7   : > { %594 = vmatprep.mubr.f32.mxu0 %v1899_v0  ;;  %630 = vmatprep.mubr.f32.mxu1 %v1899_v0 }
  0xc8   : > { %983 = vperm.xlu0 %1604, %v657_v21   ;;  %988 = vperm.xlu1 %1605, %v658_v22  }
  0xca   : > { %1422 = vmatmul.mubr.msk.f32.gmra.mrb[6].mxu0 %vm475_vm0, %v466_v16  ;;  %1428 = vmatmul.mubr.msk.f32.gmra.mrb[6].mxu1 %vm475_vm0, %v472_v17 }
  0xcb   : > { %636 = vmatprep.mubr.f32.mxu1 %v1899_v0  ;;  %600 = vmatprep.mubr.f32.mxu0 %v1899_v0 }
  0xcc   : > { %993 = vperm.xlu0 %1604, %v659_v24   ;;  %998 = vperm.xlu1 %1605, %v660_v25  }
  0xce   : > { %1429 = vmatmul.mubr.msk.f32.gmra.mrb[8].mxu1 %vm475_vm0, %v473_v20  ;;  %1423 = vmatmul.mubr.msk.f32.gmra.mrb[8].mxu0 %vm475_vm0, %v467_v27 }
  0xcf   : > { %642 = vmatprep.mubr.f32.mxu1 %v1899_v0  ;;  %606 = vmatprep.mubr.f32.mxu0 %v1899_v0 }
  0xd0   : > { %1113 = vperm.xlu0 %1604, %v661_v26  }
  0xd2   : > { %1430 = vmatmul.mubr.msk.f32.gmra.mrb[10].mxu1 %vm475_vm0, %v474_v23  ;;  %1424 = vmatmul.mubr.msk.f32.gmra.mrb[10].mxu0 %vm475_vm0, %v468_v28 }
  0xd3   : > { %1077 = vmatprep.mubr.f32.mxu1 %v1899_v0  ;;  %787 = vmatprep.mubr.f32.mxu0 %v1899_v0 }
 0x136   : > { %v2255_v29 = vpop.permute.xlu0 %664  ;;  %v2265_v37 = vpop.permute.xlu1 %674 }
 0x13a   : > { %v2263_v36 = vpop.permute.xlu0 %669  ;;  %v2279_v50 = vpop.permute.xlu1 %679 }
 0x191   : > { %v578_v30 = vpop.f32.mrb[0].mxu0  ;;  %v2257_v31 = vpop.f32.mrb[0].mxu1 }
 0x192   : > { %v682_v32 = vadd.f32 %v2255_v29, %v578_v30  ;;  %v580_v33 = vpop.f32.mrb[1].mxu0  ;;  %v2260_v34 = vpop.f32.mrb[1].mxu1  ;;  %v702_v22 = vadd.f32 %v2265_v37, %v2257_v31 }
 0x193   : > { %v683_v35 = vadd.f32 %v2255_v29, %v580_v33  ;;  %v703_v23 = vadd.f32 %v2265_v37, %v2260_v34 }
 0x194   : > { %1606 = vtanh.f32 %v682_v32 }
 0x195   : > { %v584_v38 = vpop.f32.mrb[2].mxu0  ;;  %v2267_v39 = vpop.f32.mrb[2].mxu1  ;;  %1608 = vtanh.f32 %v683_v35 }
 0x196   : > { %v684_v40 = vadd.f32 %v2263_v36, %v584_v38  ;;  %v586_v41 = vpop.f32.mrb[3].mxu0  ;;  %v2270_v42 = vpop.f32.mrb[3].mxu1  ;;  %v704_v28 = vadd.f32 %v2279_v50, %v2267_v39 }
 0x197   : > { %v685_v43 = vadd.f32 %v2263_v36, %v586_v41 }
 0x198   : > { %1610 = vtanh.f32 %v684_v40 }
 0x199   : > { %1612 = vtanh.f32 %v685_v43  ;;  %v590_v44 = vpop.f32.mrb[4].mxu0  ;;  %v2273_v45 = vpop.f32.mrb[4].mxu1 }
 0x19a   : > { %v686_v46 = vadd.f32 %v2265_v37, %v590_v44  ;;  %v592_v47 = vpop.f32.mrb[5].mxu0  ;;  %v2276_v48 = vpop.f32.mrb[5].mxu1 }
 0x19b   : > { %v687_v49 = vadd.f32 %v2265_v37, %v592_v47  ;;  %v856_v47 = vld [vmem:[#allocation6] sm:$0xff] }
 0x19c   : > { %1614 = vtanh.f32 %v686_v46 }
 0x19d   : > { %v596_v51 = vpop.f32.mrb[6].mxu0  ;;  %v2281_v52 = vpop.f32.mrb[6].mxu1  ;;  %1616 = vtanh.f32 %v687_v49  ;;  %v857_v49 = vld [vmem:[#allocation6 + $0x8] sm:$0xff] }
 0x19e   : > { %v688_v53 = vadd.f32 %v2279_v50, %v596_v51  ;;  %v598_v54 = vpop.f32.mrb[7].mxu0  ;;  %v2284_v55 = vpop.f32.mrb[7].mxu1  ;;  %v859_v51 = vld [vmem:[#allocation6 + $0x18] sm:$0xff] }
 0x19f   : > { %v689_v56 = vadd.f32 %v2279_v50, %v598_v54  ;;  %v1607_v57 = vpop.eup %1606 }
 0x1a0   : > { %1618 = vtanh.f32 %v688_v53  ;;  %v1609_v58 = vpop.eup %1608  ;;  %v831_v53 = vpop.permute.xlu0 %830 }
 0x1a1   : > { %1620 = vtanh.f32 %v689_v56  ;;  %v2287_v59 = vpop.f32.mrb[8].mxu1  ;;  %v848_v54 = vadd.f32 %v831_v53, %v2273_v45  ;;  %v849_v56 = vadd.f32 %v831_v53, %v2276_v48 }
 0x1a2   : > { %v1611_v60 = vpop.eup %1610  ;;  %v2289_v61 = vpop.f32.mrb[9].mxu1 }
 0x1a3   : > { %v1613_v62 = vpop.eup %1612  ;;  %v1449_v63 = vpack.c.bf16 %v1611_v60, %v1607_v57 }
 0x1a4   : > { %v1447_v1 = vpack.c.bf16 %v1613_v62, %v1609_v58  ;;  %v836_v62 = vpop.permute.xlu1 %835 }
 0x1a5   : > { %v2291_v2 = vpop.f32.mrb[10].mxu1 }
 0x1a6   : > { %v2293_v3 = vpop.f32.mrb[11].mxu1  ;;  %1448 = vmatprep.subr.bf16.mxu0 %v1447_v1  ;;  %v1615_v4 = vpop.eup %1614  ;;  %v850_v1 = vadd.f32 %v836_v62, %v2281_v52 }
 0x1a7   : > { %1450 = vmatpush1.bf16.msra.mxu0 %v1449_v63  ;;  %v1617_v5 = vpop.eup %1616 }
 0x1aa   : > { %v1619_v6 = vpop.eup %1618 }
 0x1ab   : > { %v1621_v7 = vpop.eup %1620  ;;  %v1453_v8 = vpack.c.bf16 %v1619_v6, %v1615_v4  ;;  %v851_v4 = vadd.f32 %v836_v62, %v2284_v55 }
 0x1ac   : > { %v1451_v9 = vpack.c.bf16 %v1621_v7, %v1617_v5 }
 0x1ae   : > { %1452 = vmatprep.subr.bf16.mxu0 %v1451_v9 }
 0x1af   : > { %1454 = vmatpush1.bf16.msra.mxu0 %v1453_v8  ;;  %v841_v8 = vpop.permute.xlu0 %840 }
 0x1b0   : > { %v852_v45 = vadd.f32 %v841_v8, %v2287_v59  ;;  %v853_v48 = vadd.f32 %v841_v8, %v2289_v61 }
 0x1b2   : > { %1431 = vmatmul.mubr.msk.f32.vlgmr.msra.gmra.mrb[8].mxu0 %vm710_vm1, %v706_v10 }
 0x1b3   : > { %793 = vmatprep.mubr.f32.mxu0 %v1899_v0 }
 0x1b6   : > { %1432 = vmatmul.mubr.msk.f32.gmra.mrb[10].mxu0 %vm710_vm1, %v707_v11 }
 0x1b7   : > { %799 = vmatprep.mubr.f32.mxu0 %v1899_v0 }
 0x1ba   : > { %1433 = vmatmul.mubr.msk.f32.gmra.mrb[12].mxu0 %vm710_vm1, %v708_v12 }
 0x1bb   : > { %805 = vmatprep.mubr.f32.mxu0 %v1899_v0 }
 0x1be   : > { %1434 = vmatmul.mubr.msk.f32.gmra.mrb[14].mxu0 %vm710_vm1, %v709_v13  ;;  %v846_v13 = vpop.permute.xlu1 %845 }
 0x1bf   : > { %936 = vmatprep.mubr.f32.mxu0 %v1899_v0  ;;  %v854_v55 = vadd.f32 %v846_v13, %v2291_v2 }
 0x285   : > { %v789_v14 = vpop.f32.mrb[8].mxu0 }
 0x286   : > { %v1489_v15 = vadd.f32 %v789_v14, %v2255_v29  ;;  %v791_v16 = vpop.f32.mrb[9].mxu0  ;;  %v855_v14 = vadd.f32 %v846_v13, %v2293_v3 }
 0x287   : > { %v1490_v17 = vadd.f32 %v791_v16, %v2255_v29  ;;  %v705_v29 = vadd.f32 %v2279_v50, %v2270_v42  ;;  %v858_v50 = vld [vmem:[#allocation6 + $0x10] sm:$0xff] }
 0x288   : > { %1622 = vtanh.f32 %v1489_v15 }
 0x289   : > { %v795_v18 = vpop.f32.mrb[10].mxu0  ;;  %1624 = vtanh.f32 %v1490_v17 }
 0x28a   : > { %v1491_v19 = vadd.f32 %v795_v18, %v2263_v36  ;;  %v797_v20 = vpop.f32.mrb[11].mxu0 }
 0x28b   : > { %v1492_v21 = vadd.f32 %v797_v20, %v2263_v36 }
 0x28c   : > { %1626 = vtanh.f32 %v1491_v19 }
 0x28d   : > { %1628 = vtanh.f32 %v1492_v21  ;;  %v801_v24 = vpop.f32.mrb[12].mxu0 }
 0x28e   : > { %v816_v25 = vadd.f32 %v801_v24, %v702_v22  ;;  %v803_v26 = vpop.f32.mrb[13].mxu0 }
 0x28f   : > { %v817_v27 = vadd.f32 %v803_v26, %v703_v23 }
 0x290   : > { %1630 = vtanh.f32 %v816_v25 }
 0x291   : > { %v807_v30 = vpop.f32.mrb[14].mxu0  ;;  %1632 = vtanh.f32 %v817_v27  ;;  %v977_v27 = vld [vmem:[#allocation9] sm:$0xff] }
 0x292   : > { %v818_v32 = vadd.f32 %v807_v30, %v704_v28  ;;  %v809_v33 = vpop.f32.mrb[15].mxu0  ;;  %v1623_v35 = vpop.eup %1622  ;;  %v978_v28 = vld [vmem:[#allocation9 + $0x8] sm:$0xff]  ;;  %v980_v30 = vld [vmem:[#allocation9 + $0x18] sm:$0xff] }
 0x293   : > { %v819_v31 = vadd.f32 %v809_v33, %v705_v29  ;;  %v1625_v34 = vpop.eup %1624  ;;  %v979_v29 = vld [vmem:[#allocation9 + $0x10] sm:$0xff]  ;;  %v984_v33 = vpop.permute.xlu0 %983 }
 0x294   : > { %1634 = vtanh.f32 %v818_v32  ;;  %v1110_v32 = vld [vmem:[#allocation10] sm:$0xf] }
 0x295   : > { %1636 = vtanh.f32 %v819_v31 }
 0x296   : > { %v1627_v36 = vpop.eup %1626 }
 0x297   : > { %v1629_v37 = vpop.eup %1628  ;;  %v1457_v38 = vpack.c.bf16 %v1627_v36, %v1623_v35 }
 0x298   : > { %v1455_v40 = vpack.c.bf16 %v1629_v37, %v1625_v34  ;;  %v989_v37 = vpop.permute.xlu1 %988 }
 0x29a   : > { %1456 = vmatprep.subr.bf16.mxu0 %v1455_v40  ;;  %v1631_v39 = vpop.eup %1630 }
 0x29b   : > { %1458 = vmatpush1.bf16.msra.mxu0 %v1457_v38  ;;  %v1633_v41 = vpop.eup %1632 }
 0x29e   : > { %v1635_v43 = vpop.eup %1634 }
 0x29f   : > { %v1637_v42 = vpop.eup %1636  ;;  %v1461_v44 = vpack.c.bf16 %v1635_v43, %v1631_v39  ;;  %v994_v43 = vpop.permute.xlu0 %993 }
 0x2a0   : > { %v1459_v46 = vpack.c.bf16 %v1637_v42, %v1633_v41 }
 0x2a2   : > { %1460 = vmatprep.subr.bf16.mxu0 %v1459_v46 }
 0x2a3   : > { %1462 = vmatpush1.bf16.msra.mxu0 %v1461_v44 }
 0x2a6   : > { %1435 = vmatmul.mubr.msk.f32.vlgmr.msra.gmra.mrb[16].mxu0 %vm710_vm1, %v856_v47  ;;  %v999_v47 = vpop.permute.xlu1 %998 }
 0x2a7   : > { %942 = vmatprep.mubr.f32.mxu0 %v1899_v0 }
 0x2aa   : > { %1436 = vmatmul.mubr.msk.f32.gmra.mrb[18].mxu0 %vm710_vm1, %v857_v49 }
 0x2ab   : > { %948 = vmatprep.mubr.f32.mxu0 %v1899_v0 }
 0x2ae   : > { %1437 = vmatmul.mubr.msk.f32.gmra.mrb[20].mxu0 %vm710_vm1, %v858_v50 }
 0x2af   : > { %954 = vmatprep.mubr.f32.mxu0 %v1899_v0 }
 0x2b2   : > { %1438 = vmatmul.mubr.msk.f32.gmra.mrb[22].mxu0 %vm710_vm1, %v859_v51 }
 0x379   : > { %v938_v57 = vpop.f32.mrb[16].mxu0 }
 0x37a   : > { %v961_v58 = vadd.f32 %v938_v57, %v848_v54  ;;  %v940_v60 = vpop.f32.mrb[17].mxu0  ;;  %v1114_v57 = vpop.permute.xlu0 %1113 }
 0x37b   : > { %v962_v63 = vadd.f32 %v940_v60, %v849_v56 }
 0x37c   : > { %1638 = vtanh.f32 %v961_v58 }
 0x37d   : > { %v944_v5 = vpop.f32.mrb[18].mxu0  ;;  %1640 = vtanh.f32 %v962_v63 }
 0x37e   : > { %v963_v6 = vadd.f32 %v944_v5, %v850_v1  ;;  %v946_v7 = vpop.f32.mrb[19].mxu0 }
 0x37f   : > { %v964_v9 = vadd.f32 %v946_v7, %v851_v4 }
 0x380   : > { %1642 = vtanh.f32 %v963_v6 }
 0x381   : > { %1644 = vtanh.f32 %v964_v9  ;;  %v950_v10 = vpop.f32.mrb[20].mxu0 }
 0x382   : > { %v965_v11 = vadd.f32 %v950_v10, %v852_v45  ;;  %v952_v12 = vpop.f32.mrb[21].mxu0 }
 0x383   : > { %v966_v52 = vadd.f32 %v952_v12, %v853_v48 }
 0x384   : > { %1646 = vtanh.f32 %v965_v11 }
 0x385   : > { %v956_v15 = vpop.f32.mrb[22].mxu0  ;;  %1648 = vtanh.f32 %v966_v52 }
 0x386   : > { %v967_v16 = vadd.f32 %v956_v15, %v854_v55  ;;  %v958_v17 = vpop.f32.mrb[23].mxu0  ;;  %v1639_v59 = vpop.eup %1638 }
 0x387   : > { %v968_v18 = vadd.f32 %v958_v17, %v855_v14  ;;  %v1641_v19 = vpop.eup %1640 }
 0x388   : > { %1650 = vtanh.f32 %v967_v16 }
 0x389   : > { %1652 = vtanh.f32 %v968_v18 }
 0x38a   : > { %v1643_v61 = vpop.eup %1642 }
 0x38b   : > { %v1645_v20 = vpop.eup %1644  ;;  %v1465_v21 = vpack.c.bf16 %v1643_v61, %v1639_v59 }
 0x38c   : > { %v1463_v22 = vpack.c.bf16 %v1645_v20, %v1641_v19 }
 0x38e   : > { %1464 = vmatprep.subr.bf16.mxu1 %v1463_v22  ;;  %v1647_v23 = vpop.eup %1646 }
 0x38f   : > { %1466 = vmatpush1.bf16.msra.mxu1 %v1465_v21  ;;  %v1649_v2 = vpop.eup %1648 }
 0x392   : > { %v1651_v24 = vpop.eup %1650 }
 0x393   : > { %v1653_v3 = vpop.eup %1652  ;;  %v1469_v25 = vpack.c.bf16 %v1651_v24, %v1647_v23 }
 0x394   : > { %v1467_v26 = vpack.c.bf16 %v1653_v3, %v1649_v2 }
 0x396   : > { %1468 = vmatprep.subr.bf16.mxu1 %v1467_v26 }
 0x397   : > { %1470 = vmatpush1.bf16.msra.mxu1 %v1469_v25 }
 0x398   : > { %1472 = vmatprep.subr.bf16.mxu1 %v1463_v22 }
 0x39a   : > { %1439 = vmatmul.mubr.msk.f32.vlgmr.msra.gmra.mrb[12].mxu1 %vm710_vm1, %v977_v27 }
 0x39b   : > { %1474 = vmatpush1.bf16.msra.mxu1 %v1465_v21  ;;  %1083 = vmatprep.mubr.f32.mxu1 %v1899_v0 }
 0x39c   : > { %1476 = vmatprep.subr.bf16.mxu1 %v1467_v26 }
 0x39e   : > { %1440 = vmatmul.mubr.msk.f32.gmra.mrb[14].mxu1 %vm710_vm1, %v978_v28 }
 0x39f   : > { %1478 = vmatpush1.bf16.msra.mxu1 %v1469_v25  ;;  %1089 = vmatprep.mubr.f32.mxu1 %v1899_v0 }
 0x3a2   : > { %1441 = vmatmul.mubr.msk.f32.gmra.mrb[16].mxu1 %vm710_vm1, %v979_v29 }
 0x3a3   : > { %1095 = vmatprep.mubr.f32.mxu1 %v1899_v0 }
 0x3a6   : > { %1442 = vmatmul.mubr.msk.f32.gmra.mrb[18].mxu1 %vm710_vm1, %v980_v30 }
 0x3a7   : > { %1183 = vmatprep.mubr.f32.mxu1 %v1899_v0 }
 0x3aa   : > { %1443 = vmatmul.mubr.msk.f32.vlgmr.msra.gmra.mrb[20].mxu1 %vm710_vm1, %v1110_v32 }
 0x3ab   : > { %1256 = vmatprep.mubr.f32.mxu1 %v1899_v0 }
 0x46d   : > { %v1079_v31 = vpop.f32.mrb[12].mxu1 }
 0x46e   : > { %v1080_v35 = vadd.f32 %v1079_v31, %v984_v33  ;;  %v1081_v34 = vpop.f32.mrb[13].mxu1 }
 0x46f   : > { %v1082_v36 = vadd.f32 %v1081_v34, %v984_v33 }
 0x470   : > { %1654 = vtanh.f32 %v1080_v35 }
 0x471   : > { %v1085_v38 = vpop.f32.mrb[14].mxu1  ;;  %1656 = vtanh.f32 %v1082_v36 }
 0x472   : > { %v1086_v40 = vadd.f32 %v1085_v38, %v989_v37  ;;  %v1087_v39 = vpop.f32.mrb[15].mxu1 }
 0x473   : > { %v1088_v41 = vadd.f32 %v1087_v39, %v989_v37 }
 0x474   : > { %1658 = vtanh.f32 %v1086_v40 }
 0x475   : > { %1660 = vtanh.f32 %v1088_v41  ;;  %v1091_v42 = vpop.f32.mrb[16].mxu1 }
 0x476   : > { %v1092_v44 = vadd.f32 %v1091_v42, %v994_v43  ;;  %v1093_v46 = vpop.f32.mrb[17].mxu1 }
 0x477   : > { %v1094_v0 = vadd.f32 %v1093_v46, %v994_v43 }
 0x478   : > { %1662 = vtanh.f32 %v1092_v44 }
 0x479   : > { %v1097_v49 = vpop.f32.mrb[18].mxu1  ;;  %1664 = vtanh.f32 %v1094_v0 }
 0x47a   : > { %v1098_v50 = vadd.f32 %v1097_v49, %v999_v47  ;;  %v1099_v51 = vpop.f32.mrb[19].mxu1  ;;  %v1655_v54 = vpop.eup %1654 }
 0x47b   : > { %v1100_v53 = vadd.f32 %v1099_v51, %v999_v47  ;;  %v1657_v56 = vpop.eup %1656 }
 0x47c   : > { %1666 = vtanh.f32 %v1098_v50 }
 0x47d   : > { %1668 = vtanh.f32 %v1100_v53  ;;  %v1185_v58 = vpop.f32.mrb[20].mxu1 }
 0x47e   : > { %v1659_v60 = vpop.eup %1658  ;;  %v1186_v62 = vadd.f32 %v1185_v58, %v1114_v57  ;;  %v1187_v63 = vpop.f32.mrb[21].mxu1 }
 0x47f   : > { %v1661_v1 = vpop.eup %1660  ;;  %v1188_v4 = vadd.f32 %v1187_v63, %v1114_v57  ;;  %v1481_v5 = vpack.c.bf16 %v1659_v60, %v1655_v54 }
 0x480   : > { %1190 = vst [vmem:[%s2345_s25] sm:$0xf] %v1186_v62  ;;  %v1479_v6 = vpack.c.bf16 %v1661_v1, %v1657_v56 }
 0x481   : > { %1191 = vst [vmem:[%s2345_s25 + $0x8] sm:$0xf] %v1188_v4 }
 0x482   : > { %1480 = vmatprep.subr.bf16.mxu1 %v1479_v6  ;;  %v1663_v7 = vpop.eup %1662 }
 0x483   : > { %1482 = vmatpush1.bf16.msra.mxu1 %v1481_v5  ;;  %v1665_v8 = vpop.eup %1664 }
 0x486   : > { %v1667_v9 = vpop.eup %1666 }
 0x487   : > { %v1669_v45 = vpop.eup %1668  ;;  %v1485_v48 = vpack.c.bf16 %v1667_v9, %v1663_v7 }
 0x488   : > { %v1483_v10 = vpack.c.bf16 %v1669_v45, %v1665_v8 }
 0x48a   : > { %1484 = vmatprep.subr.bf16.mxu1 %v1483_v10 }
 0x48b   : > { %1486 = vmatpush1.bf16.msra.mxu1 %v1485_v48 }
 0x48e   : > { %1444 = vmatmul.mubr.msk.f32.vlgmr.msra.gmra.mrb[22].mxu1 %vm710_vm1, %v1110_v32 }
 0x561   : > { %v1258_v11 = vpop.f32.mrb[22].mxu1 }
 0x562   : > { %v1259_v12 = vadd.f32 %v1258_v11, %v1114_v57  ;;  %v1260_v13 = vpop.f32.mrb[23].mxu1 }
 0x563   : > { %v1261_v52 = vadd.f32 %v1260_v13, %v1114_v57 }
 0x564   : > { %v1265_v55 = vrot.slane %v1259_v12, 4 }
 0x565   : > { %v1266_v14 = vrot.slane %v1261_v52, 4 }
 0x566   : > { %1269 = vst [vmem:[%s2345_s25] sm:$0xf0] %v1265_v55 }
 0x567   : > { %1270 = vst [vmem:[%s2345_s25 + $0x8] sm:$0xf0] %v1266_v14 }
 0x568 PF: > { %s24_s13 = sadd.s32 1, %s1888_s13  }
 0x569   : > { %p21_p7 = scmp.ge.s32.totalorder %s24_s13, 4  }
 0x56b   :  { %23 = sbr.rel (!%p21_p7) target bundleno = 4 (0x4), region = 119 }
 0x572   :  { %1293 = vsyncpa [#allocation3], 1 }
 0x573   :  { %1295 = vsyncpa [#allocation3 + $0x1], 1 }
 0x574   :  { %1296 = vsyncpa [#allocation5], 1 }
 0x575   :  { %1297 = vsyncpa [#allocation8], 1 }
 0x576   :  { %1298 = vsyncpa [#allocation11], 1 }

</bundles_post_ra>
